<compile_context>
chip_gen: v5e
topology: v5e:2x2
jax: 0.10.0
libtpu: 0.0.40
codegen_flags: <defaults>
</compile_context>

<pallas_src>
import functools

import numpy as np
import jax
import jax.numpy as jnp
from jax.experimental import pallas as pl
from jax.experimental.pallas import tpu as pltpu


def _cdiv(a: int, b: int) -> int:
    return (a + b - 1) // b


# --------------------------------------------------------------------------- #
# Kernel
# --------------------------------------------------------------------------- #
def _add_pe_kernel(x_ref, pe_ref, o_ref, *, batch: int, d_model: int,
                   tile_s: int, single_tile: bool):
    # x_ref : (tile_s, B*D)       lane-dense slab of x for this sequence tile
    # pe_ref: (num_tiles*tile_s, D)  resident pe table (constant block, 1 DMA)
    # o_ref : (tile_s, B*D)
    if single_tile:
        p = pe_ref[...]                                     # (tile_s, D)
    else:
        # tile_s is a multiple of 8 whenever there is more than one tile.
        start = pl.multiple_of(pl.program_id(0) * tile_s, 8)
        p = pe_ref[pl.ds(start, tile_s), :]                 # (tile_s, D)

    # Per-batch sliced adds: no replicated (tile_s, B*D) pe temporary, no extra
    # store stream — each slab column range is read, added, stored exactly once.
    for b in range(batch):
        lo = b * d_model
        o_ref[:, lo:lo + d_model] = (
            x_ref[:, lo:lo + d_model] + p
        ).astype(o_ref.dtype)


# --------------------------------------------------------------------------- #
# PE buffer (matches the PyTorch module's sinusoidal construction)
# --------------------------------------------------------------------------- #
def make_positional_encoding_buffer(d_model: int, max_len: int = 100) -> jnp.ndarray:
    """Deterministic sinusoidal PE buffer, shape (max_len, 1, d_model)."""
    position = np.arange(0, max_len, dtype=np.float32)[:, None]            # (max_len, 1)
    div_term = np.exp(np.arange(0, d_model, 2, dtype=np.float32)
                      * (-np.log(10000.0) / d_model))                       # (ceil(d/2),)
    pe = np.zeros((max_len, d_model), dtype=np.float32)
    pe[:, 0::2] = np.sin(position * div_term)
    pe[:, 1::2] = np.cos(position * div_term)[:, : d_model // 2]
    return jnp.asarray(pe[:, None, :])                                      # (max_len, 1, d_model)


# --------------------------------------------------------------------------- #
# Tiling heuristics
# --------------------------------------------------------------------------- #
def _tpu_vmem_capacity_bytes():
    try:
        return int(pltpu.get_tpu_info().vmem_capacity_bytes)
    except Exception:
        return None


def _auto_tiling_params():
    """Returns (target_block_bytes, vmem_limit_bytes, prefer_even_grid)."""
    vmem = _tpu_vmem_capacity_bytes()
    if vmem is None:
        # Unknown chip: conservative settings that fit every generation.
        return 4 << 20, 32 << 20, False
    if vmem <= (64 << 20):
        # v7x-like: 64 MiB physical VMEM, 2 TensorCores.  Keep the pipeline
        # footprint (2x in + 2x out + pe) around 32 MiB and prefer an even grid
        # so the "parallel" axis balances across the two cores.
        return 6 << 20, 32 << 20, True
    # v5e / v6e: 128 MiB physical VMEM, single TC.  Go bigger to amortize the
    # ~0.35 us per-grid-step overhead and DMA descriptor traffic.
    return 8 << 20, 48 << 20, False


def _choose_tile_s(seq_len: int, row_bytes: int, target_bytes: int,
                   prefer_even_grid: bool) -> int:
    """Largest sequence tile keeping one x block under `target_bytes`.

    Multiple of 8 (f32 sublane tiling) whenever seq_len > 8; tiny sequences
    fall back to the full (untiled) extent.  On 2-TC chips we optionally round
    down so the grid has an even number of steps.
    """
    if seq_len <= 8:
        return seq_len
    t = min(seq_len, max(8, target_bytes // max(row_bytes, 1)))
    t -= t % 8
    t = max(t, 8)
    if prefer_even_grid:
        n = _cdiv(seq_len, t)
        if n > 1 and n % 2 == 1:
            for cand in range(t, 7, -8):          # best-effort, round down only
                if _cdiv(seq_len, cand) % 2 == 0:
                    t = cand
                    break
    return t


# --------------------------------------------------------------------------- #
# Forward wrapper
# --------------------------------------------------------------------------- #
def positional_encoding_forward(x: jnp.ndarray, pe: jnp.ndarray, *,
                                target_block_bytes: int | None = None,
                                donate_x: bool = False) -> jnp.ndarray:
    """x: (S, B, D); pe: (max_len, 1, D). Returns x + pe[:S] (eval-mode dropout)."""
    S, B, D = x.shape
    max_len = pe.shape[0]
    assert pe.shape == (max_len, 1, D), pe.shape
    assert S <= max_len, f"seq_len={S} exceeds max_len={max_len}"

    auto_block, vmem_limit, prefer_even = _auto_tiling_params()
    if target_block_bytes is None:
        target_block_bytes = auto_block

    BD = B * D
    # Lane-dense 2-D views (row-major reshapes; pure layout plumbing).
    x2 = x.reshape(S, BD)
    pe2 = jnp.reshape(pe, (max_len, D))

    row_bytes = BD * x.dtype.itemsize
    tile_s = _choose_tile_s(S, row_bytes, target_block_bytes, prefer_even)
    num_tiles = _cdiv(S, tile_s)

    # Resident pe table: exactly num_tiles * tile_s rows so the in-kernel
    # dynamic row slice is always in bounds.  Rows >= S are zero padding; the
    # matching x rows are OOB-padded garbage whose output store Pallas masks.
    pe_rows = num_tiles * tile_s
    pe_res = pe2[:S]
    if pe_rows > S:
        pe_res = jnp.pad(pe_res, ((0, pe_rows - S), (0, 0)))

    kernel = functools.partial(_add_pe_kernel, batch=B, d_model=D,
                               tile_s=tile_s, single_tile=(num_tiles == 1))

    out2 = pl.pallas_call(
        kernel,
        out_shape=jax.ShapeDtypeStruct((S, BD), x.dtype),
        grid_spec=pltpu.PrefetchScalarGridSpec(
            num_scalar_prefetch=0,
            grid=(num_tiles,),
            in_specs=[
                pl.BlockSpec((tile_s, BD), lambda i: (i, 0)),   # x slab (pipelined)
                pl.BlockSpec((pe_rows, D), lambda i: (0, 0)),   # pe (resident, 1 DMA)
            ],
            out_specs=pl.BlockSpec((tile_s, BD), lambda i: (i, 0)),
        ),
        compiler_params=pltpu.CompilerParams(
            dimension_semantics=("parallel",),       # shard rows across v7x's 2 TCs
            vmem_limit_bytes=vmem_limit,
        ),
        # Only alias when the caller actually donates x; otherwise XLA would
        # insert a defensive copy and double HBM traffic.
        input_output_aliases=({0: 0} if donate_x else {}),
    )(x2, pe_res)

    return out2.reshape(S, B, D)


# --------------------------------------------------------------------------- #
# Self-test
# --------------------------------------------------------------------------- #
if __name__ == "__main__":
    max_len = 100
    key = jax.random.PRNGKey(0)
    k0, k1 = jax.random.split(key)

    # Primary small-shape check (seq=8, batch=2, d_model=32) — single-tile path.
    S, B, D = 8, 2, 32
    x = jax.random.normal(k0, (S, B, D), dtype=jnp.float32)
    pe = make_positional_encoding_buffer(D, max_len)

    out = jax.block_until_ready(positional_encoding_forward(x, pe))
    ref = x + pe[:S, :]
    np.testing.assert_allclose(np.asarray(out), np.asarray(ref), rtol=1e-6, atol=1e-6)

    # Secondary check: multi-tile pipelined grid with a partial last block,
    # lane-aligned d_model (B*D = 256), padded resident pe and the in-kernel
    # dynamic pe row slice (forces tile_s=16 -> grid of 3 over 40 rows).
    S2, B2, D2 = 40, 2, 128
    x_big = jax.random.normal(k1, (S2, B2, D2), dtype=jnp.float32)
    pe_big = make_positional_encoding_buffer(D2, max_len)
    out_big = jax.block_until_ready(
        positional_encoding_forward(x_big, pe_big, target_block_bytes=16 * 1024))
    ref_big = x_big + pe_big[:S2, :]
    np.testing.assert_allclose(np.asarray(out_big), np.asarray(ref_big),
                               rtol=1e-6, atol=1e-6)

    print("KERNEL_OK")
</pallas_src>

<mosaic_0001>
module attributes {stable_mosaic.version = 11 : i64} {
  func.func @_add_pe_kernel(%arg0: i32, %arg1: memref<8x64xf32, #tpu.memory_space<vmem>>, %arg2: memref<8x32xf32, #tpu.memory_space<vmem>>, %arg3: memref<8x64xf32, #tpu.memory_space<vmem>>) attributes {dimension_semantics = [#tpu.dimension_semantics<parallel>], iteration_bounds = array<i64: 1>, scalar_prefetch = 0 : i64, scratch_operands = 0 : i64, tpu.core_type = #tpu.core_type<tc>, window_params = [{transform_indices = @transform_0, window_bounds = array<i64: 8, 64>}, {pipeline_mode = #tpu.pipeline_mode<synchronous>, transform_indices = @transform_1, window_bounds = array<i64: 8, 32>}, {transform_indices = @transform_2, window_bounds = array<i64: 8, 64>}]} {
    %c0 = arith.constant 0 : index
    %c0_0 = arith.constant 0 : index
    %0 = vector.load %arg2[%c0, %c0_0] : memref<8x32xf32, #tpu.memory_space<vmem>>, vector<8x32xf32>
    %c0_1 = arith.constant 0 : index
    %c0_2 = arith.constant 0 : index
    %1 = vector.load %arg1[%c0_1, %c0_2] : memref<8x64xf32, #tpu.memory_space<vmem>>, vector<8x32xf32>
    %2 = arith.addf %1, %0 : vector<8x32xf32>
    %c0_3 = arith.constant 0 : index
    %c0_4 = arith.constant 0 : index
    %3 = vector.load %arg3[%c0_3, %c0_4] : memref<8x64xf32, #tpu.memory_space<vmem>>, vector<8x32xf32>
    tpu.vector_store %arg3[%c0_3, %c0_4], %2 {strides = array<i32>} : memref<8x64xf32, #tpu.memory_space<vmem>>, vector<8x32xf32>,
    %c0_5 = arith.constant 0 : index
    %c32 = arith.constant 32 : index
    %4 = vector.load %arg1[%c0_5, %c32] : memref<8x64xf32, #tpu.memory_space<vmem>>, vector<8x32xf32>
    %5 = arith.addf %4, %0 : vector<8x32xf32>
    %c0_6 = arith.constant 0 : index
    %c32_7 = arith.constant 32 : index
    %6 = vector.load %arg3[%c0_6, %c32_7] : memref<8x64xf32, #tpu.memory_space<vmem>>, vector<8x32xf32>
    tpu.vector_store %arg3[%c0_6, %c32_7], %5 {strides = array<i32>} : memref<8x64xf32, #tpu.memory_space<vmem>>, vector<8x32xf32>,
    return
  }
  func.func @transform_0(%arg0: i32) -> (i32, i32) {
    %c0_i32 = arith.constant 0 : i32
    %c0_i32_0 = arith.constant 0 : i32
    return %arg0, %c0_i32 : i32, i32
  }
  func.func @transform_1(%arg0: i32) -> (i32, i32) {
    %c0_i32 = arith.constant 0 : i32
    %c0_i32_0 = arith.constant 0 : i32
    %c0_i32_1 = arith.constant 0 : i32
    return %c0_i32, %c0_i32_0 : i32, i32
  }
  func.func @transform_2(%arg0: i32) -> (i32, i32) {
    %c0_i32 = arith.constant 0 : i32
    %c0_i32_0 = arith.constant 0 : i32
    return %arg0, %c0_i32 : i32, i32
  }
}

</mosaic_0001>

<bundles_post_ra>
// kernel: tpu_custom_call.1
= control target key start
LH: loop header
LB: loop body
LE: loop exit
PB: predicated region body
PF: predicated region fallthrough
CT: control target
= control target key end

     0   :  { %7 = vsyncpa [#allocation3], 0  ;;  %s181_s0 = inlined_call_operand.hbm [shape: f32[8,64], index: 0, kind: input, shape index: {}]   ;;  %s182_s1 = inlined_call_operand.hbm [shape: f32[8,32], index: 1, kind: input, shape index: {}]   ;;  %s183_s2 = inlined_call_operand.hbm [shape: f32[8,64], index: 2, kind: output, shape index: {}]  }
   0x1   :  { %8 = vsyncpa [#allocation6], 0 }
   0x2   :  { %9 = vsyncpa [#allocation4], 0  ;;  %s15_s11 = sshll.u32 %s181_s0, 4  ;;  %s153_s12 = smov [#allocation2]   ;;  %s16_s11 = int_to_ptr.hbm [resolvable:$true] %s15_s11 }
   0x3   :  { %s17_s13 = sshll.u32 %s153_s12, 4  ;;  %s26_s16 = sshll.u32 %s182_s1, 4  ;;  %s18_s13 = int_to_ptr.vmem [resolvable:$true] %s17_s13  ;;  %s27_s16 = int_to_ptr.hbm [resolvable:$true] %s26_s16 }
   0x4   :  { %20 = dma.hbm_to_vmem [thread:$0]  %s16_s11, 128, %s18_s13, [#allocation3]  }
   0x5   :  { %s154_s17 = smov [#allocation5]  }
   0x6   :  { %s28_s18 = sshll.u32 %s154_s17, 4  ;;  %s29_s18 = int_to_ptr.vmem [resolvable:$true] %s28_s18 }
   0x7   :  { %31 = dma.hbm_to_vmem [thread:$0]  %s27_s16, 128, %s29_s18, [#allocation6]  }
   0x8   :  { %147 = dma.done.wait [#allocation3], 128  }
   0x9   :  { %148 = vsyncadd [#allocation3], 4294967168 }
   0xa   :  { %149 = dma.done.wait [#allocation6], 128  }
   0xb   :  { %150 = vsyncadd [#allocation6], 4294967168  ;;  %v40_v0 = vld [vmem:[#allocation5] sm:$0xff]  ;;  %v41_v1 = vld [vmem:[#allocation2] sm:$0xff]  ;;  %vm43_vm0 = vcmask 261120   ;;  %s155_s0 = smov 32  }
   0xc   :  { %v42_v2 = vadd.f32 %v41_v1, %v40_v0  ;;  %47 = vrot.lane.b32.xlu0 %v40_v0, %s155_s0  ;;  %s156_s19 = smov [#allocation7]   ;;  %s60_s22 = sshll.u32 %s183_s2, 4  ;;  %vm51_vm1 = vcmask 523520   ;;  %s61_s22 = int_to_ptr.hbm [resolvable:$true] %s60_s22 }
   0xd   :  { %s58_s20 = sshll.u32 %s156_s19, 4  ;;  %s59_s20 = int_to_ptr.vmem [resolvable:$true] %s58_s20 }
   0xe   :  { %44 = vst.msk [vmem:[#allocation7] sm:$0xff] %vm43_vm0, %v42_v2 }
  0x7e   :  { %v48_v3 = vpop.permute.xlu0 %47 }
  0x7f   :  { %v50_v4 = vadd.f32 %v48_v3, %v41_v1 }
  0x81   :  { %52 = vst.msk [vmem:[#allocation7] sm:$0xff] %vm51_vm1, %v50_v4 }
  0x82   :  { %63 = dma.vmem_to_hbm [thread:$0]  %s59_s20, 128, %s61_s22, [#allocation4]  }
  0x83   :  { %151 = dma.done.wait [#allocation4], 128  }
  0x84   :  { %152 = vsyncadd [#allocation4], 4294967168 }
  0x85   :  { %68 = vsyncpa [#allocation3], 1 }
  0x86   :  { %69 = vsyncpa [#allocation6], 1 }
  0x87   :  { %70 = vsyncpa [#allocation4], 1 }

</bundles_post_ra>
